<compile_context>
chip_gen: v6e
topology: v6e:2x2x1
jax: 0.10.0
libtpu: 0.0.40
codegen_flags: <defaults>
</compile_context>

<pallas_src>
import jax
import jax.numpy as jnp
from jax.experimental import pallas as pl
from jax.experimental.pallas import tpu as pltpu

# ---------------- problem sizes (small, synthetic) ----------------
B = 2            # batch (sentences)
L = 16           # sequence length
V = 100          # word vocab size
P = 62           # position vocab size
WORD_DIM = 32
POS_DIM = 16
D = WORD_DIM + 2 * POS_DIM          # 64  per-token embedding width
KW = 3                              # conv kernel width
H = 64                              # encoder hidden size (num conv filters)
C = 8                               # num relation classes

N = B * L                           # 32 tokens total
OUT_ROWS = 8                        # lane/sublane-dense output slab
OUT_COLS = 128


# ---------------- single fused Pallas kernel ----------------
def fused_kernel(word_ref, pos1_ref, pos2_ref,
                 wemb_ref, p1emb_ref, p2emb_ref,
                 wc_ref, bc_ref, ws_ref, bs_ref, out_ref):
    """word/pos1/pos2: [N,1] i32 ids
       wemb: [V,WORD_DIM] f32   p1emb/p2emb: [P,POS_DIM] f32
       wc:   [3,D,H] bf16       bc: [1,H] f32
       ws:   [H,128] bf16       bs: [1,128] f32
       out:  [8,128] f32 (rows 0..B-1, cols 0..C-1 hold the logits)"""

    # ---- embedding gather as exact one-hot matmuls (rides the MXU) ----
    def gather(ids_ref, table_ref, vocab):
        ids = ids_ref[...]                                            # [N,1] i32
        iota = jax.lax.broadcasted_iota(jnp.int32, (N, vocab), 1)     # [N,vocab]
        onehot = (iota == ids).astype(jnp.float32)
        return jnp.dot(onehot, table_ref[...],
                       preferred_element_type=jnp.float32)            # [N,dim]

    e_w = gather(word_ref, wemb_ref, V)                               # [N,32]
    e_p1 = gather(pos1_ref, p1emb_ref, P)                             # [N,16]
    e_p2 = gather(pos2_ref, p2emb_ref, P)                             # [N,16]
    emb = jnp.concatenate([e_w, e_p1, e_p2], axis=-1)                 # [N,D] f32

    # ---- width-3 "same" conv over the sequence as three shifted matmuls ----
    # (zero padding at each sequence boundary; rows are batch-major B*L.)
    row = jax.lax.broadcasted_iota(jnp.int32, (N, D), 0)
    t = row % L                                                       # position in sentence
    x_prev = jnp.where(t != 0,     pltpu.roll(emb, shift=1,     axis=0), 0.0)
    x_next = jnp.where(t != L - 1, pltpu.roll(emb, shift=N - 1, axis=0), 0.0)

    bf16 = jnp.bfloat16
    conv = jnp.dot(x_prev.astype(bf16), wc_ref[0],
                   preferred_element_type=jnp.float32)                # [N,H]
    conv = conv + jnp.dot(emb.astype(bf16), wc_ref[1],
                          preferred_element_type=jnp.float32)
    conv = conv + jnp.dot(x_next.astype(bf16), wc_ref[2],
                          preferred_element_type=jnp.float32)
    conv = conv + bc_ref[...]                                         # + conv bias

    # ---- max-pool over the sequence axis, then ReLU ----
    pooled = jnp.max(conv.reshape(B, L, H), axis=1)                   # [B,H]
    act = jnp.maximum(pooled, 0.0)
    # TODO(synk): nn.Dropout(drop_encoding) is identity at inference; omitted.

    # ---- selector: linear -> logits, written as a lane-dense [8,128] slab ----
    act_pad = jnp.concatenate(
        [act, jnp.zeros((OUT_ROWS - B, H), jnp.float32)], axis=0)     # [8,H]
    logits = jnp.dot(act_pad.astype(bf16), ws_ref[...],
                     preferred_element_type=jnp.float32) + bs_ref[...]
    out_ref[...] = logits.astype(out_ref.dtype)                       # [8,128]


# ---------------- wrapper ----------------
def run_model(word, pos1, pos2, params):
    """word/pos1/pos2: int32 [B, L]. Returns logits [B, C]."""
    wemb, p1emb, p2emb, wc3, bc, ws_p, bs_p = params

    # Row-major [B,L] -> [B*L,1] is a pure bitcast reshape (no data movement).
    word_c = word.reshape(N, 1)
    pos1_c = pos1.reshape(N, 1)
    pos2_c = pos2.reshape(N, 1)

    vmem = pl.BlockSpec(memory_space=pltpu.MemorySpace.VMEM)
    out = pl.pallas_call(
        fused_kernel,
        out_shape=jax.ShapeDtypeStruct((OUT_ROWS, OUT_COLS), jnp.float32),
        in_specs=[vmem] * 10,
        out_specs=vmem,
    )(word_c, pos1_c, pos2_c, wemb, p1emb, p2emb, wc3, bc, ws_p, bs_p)
    return out[:B, :C]


# ---------------- params ----------------
def init_params(key):
    """Natural (PyTorch-like) f32 parameter shapes."""
    ks = jax.random.split(key, 7)
    word_emb = 0.02 * jax.random.normal(ks[0], (V, WORD_DIM), jnp.float32)
    pos1_emb = 0.02 * jax.random.normal(ks[1], (P, POS_DIM), jnp.float32)
    pos2_emb = 0.02 * jax.random.normal(ks[2], (P, POS_DIM), jnp.float32)
    wc = 0.02 * jax.random.normal(ks[3], (KW * D, H), jnp.float32)   # conv weight
    bc = 0.02 * jax.random.normal(ks[4], (1, H), jnp.float32)        # conv bias
    ws = 0.02 * jax.random.normal(ks[5], (H, C), jnp.float32)        # selector weight
    bs = 0.02 * jax.random.normal(ks[6], (1, C), jnp.float32)        # selector bias
    return (word_emb, pos1_emb, pos2_emb, wc, bc, ws, bs)


def prepare_params(raw):
    """One-time conversion to kernel-ready layouts (done outside the hot path)."""
    word_emb, pos1_emb, pos2_emb, wc, bc, ws, bs = raw
    wc3 = wc.reshape(KW, D, H).astype(jnp.bfloat16)                    # [3,D,H] bf16
    ws_p = jnp.zeros((H, OUT_COLS), jnp.bfloat16).at[:, :C].set(ws.astype(jnp.bfloat16))
    bs_p = jnp.zeros((1, OUT_COLS), jnp.float32).at[:, :C].set(bs)
    return (word_emb, pos1_emb, pos2_emb, wc3, bc, ws_p, bs_p)


if __name__ == "__main__":
    key = jax.random.PRNGKey(0)
    k1, k2, k3, k4 = jax.random.split(key, 4)

    word = jax.random.randint(k1, (B, L), 0, V, dtype=jnp.int32)
    pos1 = jax.random.randint(k2, (B, L), 0, P, dtype=jnp.int32)
    pos2 = jax.random.randint(k3, (B, L), 0, P, dtype=jnp.int32)
    params = prepare_params(init_params(k4))

    logits = run_model(word, pos1, pos2, params)
    jax.block_until_ready(logits)
    assert logits.shape == (B, C)
    print("KERNEL_OK")
</pallas_src>

<mosaic_0001>
module attributes {stable_mosaic.version = 11 : i64} {
  func.func @fused_kernel(%arg0: memref<32x1xi32, #tpu.memory_space<vmem>>, %arg1: memref<32x1xi32, #tpu.memory_space<vmem>>, %arg2: memref<32x1xi32, #tpu.memory_space<vmem>>, %arg3: memref<100x32xf32, #tpu.memory_space<vmem>>, %arg4: memref<62x16xf32, #tpu.memory_space<vmem>>, %arg5: memref<62x16xf32, #tpu.memory_space<vmem>>, %arg6: memref<3x64x64xbf16, #tpu.memory_space<vmem>>, %arg7: memref<1x64xf32, #tpu.memory_space<vmem>>, %arg8: memref<64x128xbf16, #tpu.memory_space<vmem>>, %arg9: memref<1x128xf32, #tpu.memory_space<vmem>>, %arg10: memref<8x128xf32, #tpu.memory_space<vmem>>) attributes {dimension_semantics = [], scalar_prefetch = 0 : i64, scratch_operands = 0 : i64, tpu.core_type = #tpu.core_type<tc>} {
    %c0 = arith.constant 0 : index
    %c0_0 = arith.constant 0 : index
    %0 = vector.load %arg0[%c0, %c0_0] : memref<32x1xi32, #tpu.memory_space<vmem>>, vector<32x1xi32>
    %1 = tpu.iota {dimensions = array<i32: 1>} : vector<32x100xi32>
    %2 = vector.broadcast %0 : vector<32x1xi32> to vector<32x100xi32>
    %3 = arith.cmpi eq, %1, %2 : vector<32x100xi32>
    %4 = arith.extui %3 : vector<32x100xi1> to vector<32x100xi32>
    %5 = arith.sitofp %4 : vector<32x100xi32> to vector<32x100xf32>
    %c0_1 = arith.constant 0 : index
    %c0_2 = arith.constant 0 : index
    %6 = vector.load %arg3[%c0_1, %c0_2] : memref<100x32xf32, #tpu.memory_space<vmem>>, vector<100x32xf32>
    %cst = arith.constant dense<0.000000e+00> : vector<32x32xf32>
    %7 = tpu.matmul %5, %6, %cst {dimension_numbers = #tpu.dot_dimension_numbers<[1], [0], [0], [1], [0, 0, 1, 1], [], []>} : vector<32x100xf32>, vector<100x32xf32>, vector<32x32xf32> -> vector<32x32xf32>
    %c0_3 = arith.constant 0 : index
    %c0_4 = arith.constant 0 : index
    %8 = vector.load %arg1[%c0_3, %c0_4] : memref<32x1xi32, #tpu.memory_space<vmem>>, vector<32x1xi32>
    %9 = tpu.iota {dimensions = array<i32: 1>} : vector<32x62xi32>
    %10 = vector.broadcast %8 : vector<32x1xi32> to vector<32x62xi32>
    %11 = arith.cmpi eq, %9, %10 : vector<32x62xi32>
    %12 = arith.extui %11 : vector<32x62xi1> to vector<32x62xi32>
    %13 = arith.sitofp %12 : vector<32x62xi32> to vector<32x62xf32>
    %c0_5 = arith.constant 0 : index
    %c0_6 = arith.constant 0 : index
    %14 = vector.load %arg4[%c0_5, %c0_6] : memref<62x16xf32, #tpu.memory_space<vmem>>, vector<62x16xf32>
    %cst_7 = arith.constant dense<0.000000e+00> : vector<32x16xf32>
    %15 = tpu.matmul %13, %14, %cst_7 {dimension_numbers = #tpu.dot_dimension_numbers<[1], [0], [0], [1], [0, 0, 1, 1], [], []>} : vector<32x62xf32>, vector<62x16xf32>, vector<32x16xf32> -> vector<32x16xf32>
    %c0_8 = arith.constant 0 : index
    %c0_9 = arith.constant 0 : index
    %16 = vector.load %arg2[%c0_8, %c0_9] : memref<32x1xi32, #tpu.memory_space<vmem>>, vector<32x1xi32>
    %17 = tpu.iota {dimensions = array<i32: 1>} : vector<32x62xi32>
    %18 = vector.broadcast %16 : vector<32x1xi32> to vector<32x62xi32>
    %19 = arith.cmpi eq, %17, %18 : vector<32x62xi32>
    %20 = arith.extui %19 : vector<32x62xi1> to vector<32x62xi32>
    %21 = arith.sitofp %20 : vector<32x62xi32> to vector<32x62xf32>
    %c0_10 = arith.constant 0 : index
    %c0_11 = arith.constant 0 : index
    %22 = vector.load %arg5[%c0_10, %c0_11] : memref<62x16xf32, #tpu.memory_space<vmem>>, vector<62x16xf32>
    %cst_12 = arith.constant dense<0.000000e+00> : vector<32x16xf32>
    %23 = tpu.matmul %21, %22, %cst_12 {dimension_numbers = #tpu.dot_dimension_numbers<[1], [0], [0], [1], [0, 0, 1, 1], [], []>} : vector<32x62xf32>, vector<62x16xf32>, vector<32x16xf32> -> vector<32x16xf32>
    %24 = tpu.concatenate %7, %15, %23 in 1 : vector<32x32xf32>, vector<32x16xf32>, vector<32x16xf32> -> vector<32x64xf32>
    %25 = tpu.iota {dimensions = array<i32: 0>} : vector<32x64xi32>
    %c16_i32 = arith.constant 16 : i32
    %c0_i32 = arith.constant 0 : i32
    %26 = arith.cmpi eq, %c16_i32, %c0_i32 : i32
    %c1_i32 = arith.constant 1 : i32
    %27 = arith.select %26, %c1_i32, %c16_i32 : i32
    %28 = vector.broadcast %27 : i32 to vector<32x64xi32>
    %29 = arith.remsi %25, %28 : vector<32x64xi32>
    %c0_i32_13 = arith.constant 0 : i32
    %30 = vector.broadcast %c0_i32_13 : i32 to vector<32x64xi32>
    %31 = arith.cmpi ne, %29, %30 : vector<32x64xi32>
    %c0_i32_14 = arith.constant 0 : i32
    %32 = vector.broadcast %c0_i32_14 : i32 to vector<32x64xi32>
    %33 = arith.cmpi slt, %29, %32 : vector<32x64xi32>
    %c0_i32_15 = arith.constant 0 : i32
    %34 = arith.cmpi slt, %27, %c0_i32_15 : i32
    %35 = vector.broadcast %34 : i1 to vector<32x64xi1>
    %36 = vector.broadcast %35 : vector<32x64xi1> to vector<32x64xi1>
    %37 = arith.xori %33, %36 : vector<32x64xi1>
    %38 = arith.andi %37, %31 : vector<32x64xi1>
    %39 = vector.broadcast %27 : i32 to vector<32x64xi32>
    %40 = arith.addi %29, %39 : vector<32x64xi32>
    %41 = arith.select %38, %40, %29 : vector<32x64xi1>, vector<32x64xi32>
    %c0_i32_16 = arith.constant 0 : i32
    %42 = vector.broadcast %c0_i32_16 : i32 to vector<32x64xi32>
    %43 = arith.cmpi ne, %41, %42 : vector<32x64xi32>
    %c1_i32_17 = arith.constant 1 : i32
    %44 = tpu.dynamic_rotate %24 by %c1_i32_17 dim 0 : vector<32x64xf32>, i32 -> vector<32x64xf32>
    %cst_18 = arith.constant 0.000000e+00 : f32
    %45 = vector.broadcast %cst_18 : f32 to vector<32x64xf32>
    %46 = arith.select %43, %44, %45 : vector<32x64xi1>, vector<32x64xf32>
    %c15_i32 = arith.constant 15 : i32
    %47 = vector.broadcast %c15_i32 : i32 to vector<32x64xi32>
    %48 = arith.cmpi ne, %41, %47 : vector<32x64xi32>
    %c31_i32 = arith.constant 31 : i32
    %49 = tpu.dynamic_rotate %24 by %c31_i32 dim 0 : vector<32x64xf32>, i32 -> vector<32x64xf32>
    %cst_19 = arith.constant 0.000000e+00 : f32
    %50 = vector.broadcast %cst_19 : f32 to vector<32x64xf32>
    %51 = arith.select %48, %49, %50 : vector<32x64xi1>, vector<32x64xf32>
    %52 = arith.truncf %46 : vector<32x64xf32> to vector<32x64xbf16>
    %c0_20 = arith.constant 0 : index
    %c0_21 = arith.constant 0 : index
    %c0_22 = arith.constant 0 : index
    %53 = vector.load %arg6[%c0_20, %c0_21, %c0_22] : memref<3x64x64xbf16, #tpu.memory_space<vmem>>, vector<1x64x64xbf16>
    %54 = vector.shape_cast %53 : vector<1x64x64xbf16> to vector<64x64xbf16>
    %cst_23 = arith.constant dense<0.000000e+00> : vector<32x64xf32>
    %55 = tpu.matmul %52, %54, %cst_23 {dimension_numbers = #tpu.dot_dimension_numbers<[1], [0], [0], [1], [0, 0, 1, 1], [], []>} : vector<32x64xbf16>, vector<64x64xbf16>, vector<32x64xf32> -> vector<32x64xf32>
    %56 = arith.truncf %24 : vector<32x64xf32> to vector<32x64xbf16>
    %c1 = arith.constant 1 : index
    %c0_24 = arith.constant 0 : index
    %c0_25 = arith.constant 0 : index
    %57 = vector.load %arg6[%c1, %c0_24, %c0_25] : memref<3x64x64xbf16, #tpu.memory_space<vmem>>, vector<1x64x64xbf16>
    %58 = vector.shape_cast %57 : vector<1x64x64xbf16> to vector<64x64xbf16>
    %cst_26 = arith.constant dense<0.000000e+00> : vector<32x64xf32>
    %59 = tpu.matmul %56, %58, %cst_26 {dimension_numbers = #tpu.dot_dimension_numbers<[1], [0], [0], [1], [0, 0, 1, 1], [], []>} : vector<32x64xbf16>, vector<64x64xbf16>, vector<32x64xf32> -> vector<32x64xf32>
    %60 = arith.addf %55, %59 : vector<32x64xf32>
    %61 = arith.truncf %51 : vector<32x64xf32> to vector<32x64xbf16>
    %c2 = arith.constant 2 : index
    %c0_27 = arith.constant 0 : index
    %c0_28 = arith.constant 0 : index
    %62 = vector.load %arg6[%c2, %c0_27, %c0_28] : memref<3x64x64xbf16, #tpu.memory_space<vmem>>, vector<1x64x64xbf16>
    %63 = vector.shape_cast %62 : vector<1x64x64xbf16> to vector<64x64xbf16>
    %cst_29 = arith.constant dense<0.000000e+00> : vector<32x64xf32>
    %64 = tpu.matmul %61, %63, %cst_29 {dimension_numbers = #tpu.dot_dimension_numbers<[1], [0], [0], [1], [0, 0, 1, 1], [], []>} : vector<32x64xbf16>, vector<64x64xbf16>, vector<32x64xf32> -> vector<32x64xf32>
    %65 = arith.addf %60, %64 : vector<32x64xf32>
    %c0_30 = arith.constant 0 : index
    %c0_31 = arith.constant 0 : index
    %66 = vector.load %arg7[%c0_30, %c0_31] : memref<1x64xf32, #tpu.memory_space<vmem>>, vector<1x64xf32>
    %67 = vector.broadcast %66 : vector<1x64xf32> to vector<32x64xf32>
    %68 = arith.addf %65, %67 : vector<32x64xf32>
    %69 = vector.shape_cast %68 : vector<32x64xf32> to vector<2x16x64xf32>
    %cst_32 = arith.constant dense<0xFF800000> : vector<2x64xf32>
    %70 = vector.multi_reduction <maximumf>, %69, %cst_32 [1] : vector<2x16x64xf32> to vector<2x64xf32>
    %cst_33 = arith.constant 0.000000e+00 : f32
    %71 = vector.broadcast %cst_33 : f32 to vector<2x64xf32>
    %72 = arith.maximumf %70, %71 : vector<2x64xf32>
    %cst_34 = arith.constant 0.000000e+00 : f32
    %73 = vector.broadcast %cst_34 : f32 to vector<6x64xf32>
    %74 = tpu.concatenate %72, %73 in 0 : vector<2x64xf32>, vector<6x64xf32> -> vector<8x64xf32>
    %75 = arith.truncf %74 : vector<8x64xf32> to vector<8x64xbf16>
    %c0_35 = arith.constant 0 : index
    %c0_36 = arith.constant 0 : index
    %76 = vector.load %arg8[%c0_35, %c0_36] : memref<64x128xbf16, #tpu.memory_space<vmem>>, vector<64x128xbf16>
    %cst_37 = arith.constant dense<0.000000e+00> : vector<8x128xf32>
    %77 = tpu.matmul %75, %76, %cst_37 {dimension_numbers = #tpu.dot_dimension_numbers<[1], [0], [0], [1], [0, 0, 1, 1], [], []>} : vector<8x64xbf16>, vector<64x128xbf16>, vector<8x128xf32> -> vector<8x128xf32>
    %c0_38 = arith.constant 0 : index
    %c0_39 = arith.constant 0 : index
    %78 = vector.load %arg9[%c0_38, %c0_39] : memref<1x128xf32, #tpu.memory_space<vmem>>, vector<1x128xf32>
    %79 = vector.broadcast %78 : vector<1x128xf32> to vector<8x128xf32>
    %80 = arith.addf %77, %79 : vector<8x128xf32>
    %c0_40 = arith.constant 0 : index
    %c0_41 = arith.constant 0 : index
    %81 = vector.load %arg10[%c0_40, %c0_41] : memref<8x128xf32, #tpu.memory_space<vmem>>, vector<8x128xf32>
    tpu.vector_store %arg10[%c0_40, %c0_41], %80 {strides = array<i32>} : memref<8x128xf32, #tpu.memory_space<vmem>>, vector<8x128xf32>,
    return
  }
}

</mosaic_0001>

<bundles_post_ra>
// kernel: tpu_custom_call.1
= control target key start
LH: loop header
LB: loop body
LE: loop exit
PB: predicated region body
PF: predicated region fallthrough
CT: control target
= control target key end

     0   :  { %v1317_v2 = vmov 0   ;;  %vm231_vm0 = vcmask 1045504   ;;  %vm93_vm1 = vcmask 1043456   ;;  %s1672_s0 = inlined_call_operand.vmem [shape: s32[32,1], index: 0, kind: input, shape index: {}]   ;;  %s1673_s1 = inlined_call_operand.vmem [shape: s32[32,1], index: 1, kind: input, shape index: {}]   ;;  %s1674_s2 = inlined_call_operand.vmem [shape: s32[32,1], index: 2, kind: input, shape index: {}]   ;;  %s1675_s3 = inlined_call_operand.vmem [shape: f32[100,32], index: 3, kind: input, shape index: {}]   ;;  %s1676_s4 = inlined_call_operand.vmem [shape: f32[62,16], index: 4, kind: input, shape index: {}]   ;;  %s1677_s5 = inlined_call_operand.vmem [shape: f32[62,16], index: 5, kind: input, shape index: {}]   ;;  %s1678_s6 = inlined_call_operand.vmem [shape: bf16[3,64,64], index: 6, kind: input, shape index: {}]   ;;  %s1679_s7 = inlined_call_operand.vmem [shape: f32[1,64], index: 7, kind: input, shape index: {}]   ;;  %s1680_s8 = inlined_call_operand.vmem [shape: bf16[64,128], index: 8, kind: input, shape index: {}]   ;;  %s1681_s9 = inlined_call_operand.vmem [shape: f32[1,128], index: 9, kind: input, shape index: {}]   ;;  %s1682_s10 = inlined_call_operand.hbm [shape: f32[8,128], index: 10, kind: output, shape index: {}]  }
   0x1   :  { %v184_v0 = vld [vmem:[%s1673_s1 + $0x10] sm:$0xff]  ;;  %v182_v1 = vld [vmem:[%s1673_s1] sm:$0xff]  ;;  %1258 = vset.pattern.permute.xlu1 %v1317_v2  ;;  %1257 = vset.pattern.permute.xlu0 %v1317_v2  ;;  %v185_v3 = vld [vmem:[%s1673_s1 + $0x18] sm:$0xff] }
   0x2   :  { %193 = vperm.xlu1 %1258, %v184_v0   ;;  %187 = vperm.xlu0 %1257, %v182_v1   ;;  %v183_v4 = vld [vmem:[%s1673_s1 + $0x8] sm:$0xff]  ;;  %v217_v5 = vld [vmem:[%s1676_s4 + $0x38] sm:$0x3f]  ;;  %v79_v6 = vld [vmem:[%s1675_s3 + $0x60] sm:$0xf] }
   0x3   :  { %1159 = vmatprep.subr.msk.mxu1 %vm231_vm0, %v217_v5  ;;  %v216_v7 = vld [vmem:[%s1676_s4 + $0x30] sm:$0xff]  ;;  %1127 = vmatprep.subr.msk.mxu0 %vm93_vm1, %v79_v6  ;;  %v78_v8 = vld [vmem:[%s1675_s3 + $0x58] sm:$0xff]  ;;  %v321_v9 = vld [vmem:[%s1674_s2 + $0x8] sm:$0xff] }
   0x4   :  { %v320_v10 = vld [vmem:[%s1674_s2] sm:$0xff]  ;;  %1160 = vmatpush3.msk.msra.mxu1 %vm231_vm0, %v217_v5  ;;  %1128 = vmatpush3.msk.msra.mxu0 %vm93_vm1, %v79_v6  ;;  %v215_v11 = vld [vmem:[%s1676_s4 + $0x28] sm:$0xff]  ;;  %v77_v12 = vld [vmem:[%s1675_s3 + $0x50] sm:$0xff] }
   0x5   :  { %1161 = vmatprep.subr.mxu1 %v216_v7  ;;  %1129 = vmatprep.subr.mxu0 %v78_v8  ;;  %v214_v13 = vld [vmem:[%s1676_s4 + $0x20] sm:$0xff]  ;;  %v76_v14 = vld [vmem:[%s1675_s3 + $0x48] sm:$0xff]  ;;  %v323_v15 = vld [vmem:[%s1674_s2 + $0x18] sm:$0xff] }
   0x6   :  { %196 = vperm.xlu1 %1258, %v185_v3   ;;  %190 = vperm.xlu0 %1257, %v183_v4   ;;  %v322_v16 = vld [vmem:[%s1674_s2 + $0x10] sm:$0xff]  ;;  %v38_v17 = vld [vmem:[%s1672_s0 + $0x8] sm:$0xff]  ;;  %v213_v18 = vld [vmem:[%s1676_s4 + $0x18] sm:$0xff] }
   0x7   :  { %1162 = vmatpush3.msra.mxu1 %v216_v7  ;;  %1130 = vmatpush3.msra.mxu0 %v78_v8  ;;  %v75_v19 = vld [vmem:[%s1675_s3 + $0x40] sm:$0xff]  ;;  %v212_v21 = vld [vmem:[%s1676_s4 + $0x10] sm:$0xff]  ;;  %v211_v22 = vld [vmem:[%s1676_s4 + $0x8] sm:$0xff] }
   0x8   :  { %1163 = vmatprep.subr.mxu1 %v215_v11  ;;  %1131 = vmatprep.subr.mxu0 %v77_v12  ;;  %v37_v20 = vld [vmem:[%s1672_s0] sm:$0xff]  ;;  %v74_v23 = vld [vmem:[%s1675_s3 + $0x38] sm:$0xff]  ;;  %v39_v25 = vld [vmem:[%s1672_s0 + $0x10] sm:$0xff] }
   0x9   :  { %1164 = vmatpush3.msra.mxu1 %v215_v11  ;;  %1132 = vmatpush3.msra.mxu0 %v77_v12  ;;  %v40_v24 = vld [vmem:[%s1672_s0 + $0x18] sm:$0xff]  ;;  %v73_v26 = vld [vmem:[%s1675_s3 + $0x30] sm:$0xff]  ;;  %v210_v27 = vld [vmem:[%s1676_s4] sm:$0xff] }
   0xa   :  { %328 = vperm.xlu1 %1258, %v321_v9   ;;  %325 = vperm.xlu0 %1257, %v320_v10   ;;  %v72_v28 = vld [vmem:[%s1675_s3 + $0x28] sm:$0xff]  ;;  %v355_v29 = vld [vmem:[%s1677_s5 + $0x38] sm:$0x3f]  ;;  %v71_v30 = vld [vmem:[%s1675_s3 + $0x20] sm:$0xff] }
   0xb   :  { %1165 = vmatprep.subr.mxu1 %v214_v13  ;;  %1133 = vmatprep.subr.mxu0 %v76_v14 }
   0xc   :  { %1166 = vmatpush3.msra.mxu1 %v214_v13  ;;  %1134 = vmatpush3.msra.mxu0 %v76_v14 }
   0xd   :  { %1167 = vmatprep.subr.mxu1 %v213_v18  ;;  %1135 = vmatprep.subr.mxu0 %v75_v19 }
   0xe   :  { %334 = vperm.xlu1 %1258, %v323_v15   ;;  %331 = vperm.xlu0 %1257, %v322_v16  }
   0xf   :  { %1168 = vmatpush3.msra.mxu1 %v213_v18  ;;  %1136 = vmatpush3.msra.mxu0 %v75_v19 }
  0x10   :  { %1169 = vmatprep.subr.mxu1 %v212_v21  ;;  %1137 = vmatprep.subr.mxu0 %v74_v23 }
  0x11   :  { %1170 = vmatpush3.msra.mxu1 %v212_v21  ;;  %1138 = vmatpush3.msra.mxu0 %v74_v23 }
  0x12   :  { %47 = vperm.xlu1 %1258, %v38_v17   ;;  %44 = vperm.xlu0 %1257, %v37_v20  }
  0x13   :  { %1171 = vmatprep.subr.mxu1 %v211_v22  ;;  %1139 = vmatprep.subr.mxu0 %v73_v26 }
  0x14   :  { %1172 = vmatpush3.msra.mxu1 %v211_v22  ;;  %1140 = vmatpush3.msra.mxu0 %v73_v26 }
  0x15   :  { %1173 = vmatprep.subr.mxu1 %v210_v27  ;;  %1141 = vmatprep.subr.mxu0 %v72_v28 }
  0x16   :  { %53 = vperm.xlu1 %1258, %v40_v24   ;;  %50 = vperm.xlu0 %1257, %v39_v25  }
  0x17   :  { %15 = vsyncpa [#allocation3], 0  ;;  %1174 = vmatpush3.msra.mxu1 %v210_v27  ;;  %1142 = vmatpush3.msra.mxu0 %v72_v28  ;;  %v70_v31 = vld [vmem:[%s1675_s3 + $0x18] sm:$0xff]  ;;  %v69_v32 = vld [vmem:[%s1675_s3 + $0x10] sm:$0xff]  ;;  %v41_v35 = vlaneseq  ;;  %vm218_vm2 = vcmask 506880   ;;  %v1318_v39 = vmov 0.0  }
  0x18   :  { %1181 = vmatprep.subr.msk.mxu1 %vm231_vm0, %v355_v29  ;;  %1143 = vmatprep.subr.mxu0 %v71_v30  ;;  %v68_v33 = vld [vmem:[%s1675_s3 + $0x8] sm:$0xff]  ;;  %v67_v34 = vld [vmem:[%s1675_s3] sm:$0xff]  ;;  %v354_v45 = vld [vmem:[%s1677_s5 + $0x30] sm:$0xff]  ;;  %vm80_vm8 = vcmask 818176   ;;  %s1319_s2 = smov 32   ;;  %s1320_s20 = smov 48  }
  0x19   :  { %1144 = vmatpush3.msra.mxu0 %v71_v30  ;;  %v1484_v36 = vand.u32 127, %v41_v35  ;;  %v353_v49 = vld [vmem:[%s1677_s5 + $0x28] sm:$0xff]  ;;  %v352_v51 = vld [vmem:[%s1677_s5 + $0x20] sm:$0xff]  ;;  %v351_v54 = vld [vmem:[%s1677_s5 + $0x18] sm:$0xff]  ;;  %v1576_v27 = vshrl.u32 %v41_v35, 7  ;;  %vm493_vm1 = vcmask 392192  }
  0x1a   :  { %1145 = vmatprep.subr.mxu0 %v70_v31  ;;  %v350_v55 = vld [vmem:[%s1677_s5 + $0x10] sm:$0xff]  ;;  %v349_v58 = vld [vmem:[%s1677_s5 + $0x8] sm:$0xff]  ;;  %v348_v61 = vld [vmem:[%s1677_s5] sm:$0xff]  ;;  %s1322_s11 = smov [#allocation2]  }
  0x1b   :  { %1146 = vmatpush3.msra.mxu0 %v70_v31  ;;  %v1279_v5 = vld [vmem:[%s1678_s6 + $0x38] sm:$0xff]   ;;  %v1280_v6 = vld [vmem:[%s1678_s6 + $0x30] sm:$0xff]   ;;  %v1282_v14 = vld [vmem:[%s1678_s6 + $0x28] sm:$0xff]   ;;  %v501_v30 = vadd.s32 16, %v1576_v27  ;;  %s987_s12 = sshll.u32 %s1322_s11, 4  ;;  %s988_s12 = int_to_ptr.vmem [resolvable:$true] %s987_s12 }
  0x1c   :  { %1147 = vmatprep.subr.mxu0 %v69_v32  ;;  %v1281_v7 = vld [vmem:[%s1678_s6 + $0x18] sm:$0xff]   ;;  %v1283_v15 = vld [vmem:[%s1678_s6 + $0x10] sm:$0xff]   ;;  %v1284_v16 = vld [vmem:[%s1678_s6 + $0x20] sm:$0xff]   ;;  %s1295_s13 = scalar_lea.vmem %s988_s12, 128  ;;  %p1300_p1 = scmp.lt.s32.totalorder %s988_s12, %s988_s12 }
  0x1d   :  { %1148 = vmatpush3.msra.mxu0 %v69_v32  ;;  %v1285_v17 = vld [vmem:[%s1678_s6 + $0x8] sm:$0xff]   ;;  %v1568_v18 = vld [vmem:[%s1678_s6 + $0x58] sm:$0xff]   ;;  %v1287_v21 = vld [vmem:[%s1678_s6] sm:$0xff]   ;;  %p1296_p0 = scmp.ne.s32.totalorder %s988_s12, %s1295_s13  ;;  %p1301_p2 = scmp.lt.s32.totalorder %s1295_s13, %s1295_s13 }
  0x1e   :  { %1149 = vmatprep.subr.mxu0 %v68_v33 }
  0x1f   :  { %1150 = vmatpush3.msra.mxu0 %v68_v33  ;;  %p1302_p3 = por %p1301_p2, %p1300_p1 }
  0x20   :  { %1151 = vmatprep.subr.mxu0 %v67_v34 }
  0x21   :  { %1152 = vmatpush3.msra.mxu0 %v67_v34  ;;  %p1303_p4 = pnand %p1302_p3, %p1296_p0 }
  0x22   :  { %1203 = vmatprep.subr.bf16.mxu0 %v1279_v5 }
  0x7d   :  { %v194_v37 = vpop.permute.xlu1 %193  ;;  %v188_v38 = vpop.permute.xlu0 %187 }
  0x7e   :  { %vm198_vm3 = vcmp.eq.s32.totalorder %v1484_v36, %v188_v38  ;;  %vm200_vm4 = vcmp.eq.s32.totalorder %v1484_v36, %v194_v37 }
  0x7f   :  { %v1004_v40 = vsel %vm198_vm3, 1.0, %v1318_v39  ;;  %v1006_v43 = vsel %vm200_vm4, 1.0, %v1318_v39  ;;  %vm630_vm3 = vcmask 523264  }
  0x80   :  { %1175 = vmatprep.mubr.msk.f32.mxu1 %vm218_vm2, %v1004_v40  ;;  %v521_v40 = vand.u32 15, %v501_v30  ;;  %v1294_v30 = vld [vmem:[%s1680_s8] sm:$0xff]  }
  0x81   :  { %v197_v41 = vpop.permute.xlu1 %196  ;;  %v191_v42 = vpop.permute.xlu0 %190 }
  0x82   :  { %vm201_vm5 = vcmp.eq.s32.totalorder %v1484_v36, %v197_v41  ;;  %vm199_vm6 = vcmp.eq.s32.totalorder %v1484_v36, %v191_v42  ;;  %v500_v41 = vadd.s32 8, %v1576_v27  ;;  %vm1588_vm4 = vcmp.ne.s32.totalorder %v521_v40, 0 }
  0x83   :  { %v1005_v44 = vsel %vm199_vm6, 1.0, %v1318_v39  ;;  %v1007_v46 = vsel %vm201_vm5, 1.0, %v1318_v39  ;;  %vm576_vm5 = vcmp.lt.s32.totalorder %v1576_v27, 7 }
  0x84   :  { %1176 = vmatmul.mubr.msk.f32.vlgmr.msra.gmra.mxu1 %vm218_vm2, %v1005_v44 }
  0x85   :  { %1182 = vmatpush3.msk.msra.mxu1 %vm231_vm0, %v355_v29  ;;  %v329_v47 = vpop.permute.xlu1 %328  ;;  %v326_v48 = vpop.permute.xlu0 %325  ;;  %1178 = vmatprep.mubr.msk.f32.mxu1 %vm218_vm2, %v1006_v43  ;;  %vm488_vm0 = vcmask 261120  }
  0x86   :  { %vm336_vm7 = vcmp.eq.s32.totalorder %v1484_v36, %v326_v48  ;;  %1183 = vmatprep.subr.mxu1 %v354_v45  ;;  %vm337_vm11 = vcmp.eq.s32.totalorder %v1484_v36, %v329_v47  ;;  %v507_v48 = vand.u32 15, %v1576_v27 }
  0x87   :  { %v1013_v50 = vsel %vm336_vm7, 1.0, %v1318_v39  ;;  %1184 = vmatpush3.msra.mxu1 %v354_v45  ;;  %v1014_v0 = vsel %vm337_vm11, 1.0, %v1318_v39  ;;  %vm895_vm11 = vcmask 1041408  }
  0x88   :  { %1185 = vmatprep.subr.mxu1 %v353_v49  ;;  %1179 = vmatmul.mubr.msk.f32.gmra.mxu1 %vm218_vm2, %v1007_v46  ;;  %vm1599_vm6 = vcmp.ne.s32.totalorder %v507_v48, 0 }
  0x89   :  { %1186 = vmatpush3.msra.mxu1 %v353_v49  ;;  %v335_v52 = vpop.permute.xlu1 %334  ;;  %v332_v53 = vpop.permute.xlu0 %331  ;;  %1197 = vmatprep.mubr.msk.f32.mxu1 %vm218_vm2, %v1013_v50 }
  0x8a   :  { %1187 = vmatprep.subr.mxu1 %v352_v51  ;;  %vm338_vm12 = vcmp.eq.s32.totalorder %v1484_v36, %v332_v53  ;;  %vm339_vm15 = vcmp.eq.s32.totalorder %v1484_v36, %v335_v52  ;;  %v514_v53 = vand.u32 15, %v500_v41 }
  0x8b   :  { %1188 = vmatpush3.msra.mxu1 %v352_v51  ;;  %v1015_v3 = vsel %vm338_vm12, 1.0, %v1318_v39  ;;  %v1016_v4 = vsel %vm339_vm15, 1.0, %v1318_v39 }
  0x8c   :  { %1189 = vmatprep.subr.mxu1 %v351_v54  ;;  %vm1603_vm7 = vcmp.ne.s32.totalorder %v514_v53, 15 }
  0x8d   :  { %1190 = vmatpush3.msra.mxu1 %v351_v54  ;;  %v48_v56 = vpop.permute.xlu1 %47  ;;  %v45_v57 = vpop.permute.xlu0 %44 }
  0x8e   :  { %1191 = vmatprep.subr.mxu1 %v350_v55  ;;  %vm56_vm9 = vcmp.eq.s32.totalorder %v1484_v36, %v48_v56  ;;  %vm55_vm10 = vcmp.eq.s32.totalorder %v1484_v36, %v45_v57 }
  0x8f   :  { %v996_v59 = vsel %vm56_vm9, 1.0, %v1318_v39  ;;  %1192 = vmatpush3.msra.mxu1 %v350_v55  ;;  %v995_v60 = vsel %vm55_vm10, 1.0, %v1318_v39  ;;  %vm1321_vm9 = vmmov 0   ;;  %vm892_vm10 = vcmask 1041409  }
  0x90   :  { %1193 = vmatprep.subr.mxu1 %v349_v58  ;;  %1153 = vmatprep.mubr.msk.f32.mxu0 %vm80_vm8, %v995_v60 }
  0x91   :  { %1194 = vmatpush3.msra.mxu1 %v349_v58  ;;  %v54_v62 = vpop.permute.xlu1 %53  ;;  %1154 = vmatmul.mubr.msk.f32.vlgmr.msra.gmra.mxu0 %vm80_vm8, %v996_v59  ;;  %v51_v63 = vpop.permute.xlu0 %50 }
  0x92   :  { %1195 = vmatprep.subr.mxu1 %v348_v61  ;;  %vm58_vm13 = vcmp.eq.s32.totalorder %v1484_v36, %v54_v62  ;;  %vm57_vm14 = vcmp.eq.s32.totalorder %v1484_v36, %v51_v63  ;;  %1204 = vmatpush3.bf16.msra.mxu0 %v1279_v5 }
  0x93   :  { %v998_v1 = vsel %vm58_vm13, 1.0, %v1318_v39  ;;  %v997_v2 = vsel %vm57_vm14, 1.0, %v1318_v39  ;;  %1196 = vmatpush3.msra.mxu1 %v348_v61  ;;  %1205 = vmatprep.subr.bf16.mxu0 %v1280_v6 }
  0x94   :  { %1198 = vmatmul.mubr.msk.f32.vlgmr.msra.gmra.mxu1 %vm218_vm2, %v1014_v0  ;;  %1156 = vmatprep.mubr.msk.f32.mxu0 %vm80_vm8, %v997_v2 }
  0x95   :  { %1200 = vmatprep.mubr.msk.f32.mxu1 %vm218_vm2, %v1015_v3  ;;  %1157 = vmatmul.mubr.msk.f32.gmra.mxu0 %vm80_vm8, %v998_v1  ;;  %v1288_v3 = vld [vmem:[%s1678_s6 + $0x50] sm:$0xff]  }
  0x96   :  { %1215 = vmatprep.subr.bf16.mxu1 %v1281_v7  ;;  %1206 = vmatpush3.bf16.msra.mxu0 %v1280_v6  ;;  %v502_v6 = vadd.s32 24, %v1576_v27 }
  0x97   :  { %1216 = vmatpush3.bf16.msra.mxu1 %v1281_v7  ;;  %1207 = vmatprep.subr.bf16.mxu0 %v1282_v14 }
  0x98   :  { %1201 = vmatmul.mubr.msk.f32.gmra.mxu1 %vm218_vm2, %v1016_v4  ;;  %1217 = vmatprep.subr.bf16.mxu1 %v1283_v15  ;;  %vm559_vm2 = vcmp.lt.s32.totalorder %v1576_v27, 1  ;;  %v1293_v27 = vld [vmem:[%s1680_s8 + $0x8] sm:$0xff]  }
  0x9a   :  { %1208 = vmatpush3.bf16.msra.mxu0 %v1282_v14 }
  0x9b   :  { %1218 = vmatpush3.bf16.msra.mxu1 %v1283_v15  ;;  %1209 = vmatprep.subr.bf16.mxu0 %v1284_v16 }
  0x9c   :  { %1219 = vmatprep.subr.bf16.mxu1 %v1285_v17 }
  0x9e   :  { %1210 = vmatpush3.bf16.msra.mxu0 %v1284_v16 }
  0x9f   :  { %1220 = vmatpush3.bf16.msra.mxu1 %v1285_v17  ;;  %1227 = vmatprep.subr.bf16.mxu0 %v1568_v18 }
  0xa0   :  { %1221 = vmatprep.subr.bf16.mxu1 %v1287_v21 }
  0xa3   :  { %1222 = vmatpush3.bf16.msra.mxu1 %v1287_v21  ;;  %v528_v21 = vand.u32 15, %v502_v6 }
  0xa4   :  { %1239 = vmatprep.subr.bf16.mxu1 %v1318_v39 }
  0xa5   :  { %vm571_vm8 = vcmp.ne.s32.totalorder %v528_v21, 15 }
 0x144   :  { %v1177_v8 = vpop.f32.mrf.mxu1 }
 0x146   :  { %v301_v9 = vpop.f32.mrf.mxu1 }
 0x147   :  { %v1259_v10 = vpack.i.bf16 %v1177_v8, %v301_v9 }
 0x148   :  { %v1180_v11 = vpop.f32.mrf.mxu1 }
 0x149   :  { %1260 = vrot.lane.b32.xlu0 %v1259_v10, %s1319_s2 }
 0x14a   :  { %v311_v12 = vpop.f32.mrf.mxu1 }
 0x14b   :  { %v1264_v13 = vpack.i.bf16 %v1180_v11, %v311_v12 }
 0x14d   :  { %1265 = vrot.lane.b32.xlu1 %v1264_v13, %s1319_s2 }
 0x151   :  { %v1155_v26 = vpop.f32.mrf.mxu0 }
 0x153   :  { %v163_v29 = vpop.f32.mrf.mxu0 }
 0x154   :  { %v1199_v19 = vpop.f32.mrf.mxu1 }
 0x155   :  { %v1158_v36 = vpop.f32.mrf.mxu0 }
 0x156   :  { %v437_v20 = vpop.f32.mrf.mxu1 }
 0x157   :  { %v1269_v22 = vpack.i.bf16 %v1199_v19, %v437_v20  ;;  %v173_v49 = vpop.f32.mrf.mxu0  ;;  %v1289_v20 = vld [vmem:[%s1678_s6 + $0x48] sm:$0xff]  }
 0x158   :  { %v1202_v23 = vpop.f32.mrf.mxu1 }
 0x159   :  { %1270 = vrot.lane.b32.xlu0 %v1269_v22, %s1320_s20 }
 0x15a   :  { %v447_v24 = vpop.f32.mrf.mxu1 }
 0x15b   :  { %v1274_v25 = vpack.i.bf16 %v1202_v23, %v447_v24 }
 0x15d   :  { %1275 = vrot.lane.b32.xlu1 %v1274_v25, %s1320_s20 }
 0x1bb   :  { %v1261_v28 = vpop.permute.xlu0 %1260 }
 0x1bc   :  { %v1263_v31 = vunpack.i.h.bf16 %v1261_v28  ;;  %v1262_v32 = vunpack.i.l.bf16 %v1261_v28  ;;  %v1291_v28 = vld [vmem:[%s1680_s8 + $0x18] sm:$0xff]  }
 0x1be   :  { %v490_v42 = vsel %vm488_vm0, %v1155_v26, %v1263_v31  ;;  %v489_v35 = vsel %vm488_vm0, %v163_v29, %v1262_v32  ;;  %v1292_v29 = vld [vmem:[%s1680_s8 + $0x10] sm:$0xff]  }
 0x1bf   :  { %v1266_v33 = vpop.permute.xlu1 %1265 }
 0x1c0   :  { %v1268_v43 = vunpack.i.h.bf16 %v1266_v33  ;;  %v1267_v44 = vunpack.i.l.bf16 %v1266_v33 }
 0x1c2   :  { %v491_v54 = vsel %vm488_vm0, %v173_v49, %v1267_v44  ;;  %v492_v55 = vsel %vm488_vm0, %v1158_v36, %v1268_v43  ;;  %v1056_v44 = vld [vmem:[%s1679_s7] ss:$0 sm:$0xff] }
 0x1cb   :  { %v1271_v34 = vpop.permute.xlu0 %1270 }
 0x1cc   :  { %v1273_v37 = vunpack.i.h.bf16 %v1271_v34  ;;  %v1272_v38 = vunpack.i.l.bf16 %v1271_v34 }
 0x1ce   :  { %v494_v45 = vsel %vm493_vm1, %v489_v35, %v1272_v38  ;;  %v495_v46 = vsel %vm493_vm1, %v490_v42, %v1273_v37 }
 0x1cf   :  { %v1276_v47 = vpop.permute.xlu1 %1275  ;;  %v595_v50 = vpack.c.bf16 %v495_v46, %v494_v45  ;;  %v555_v56 = vrot.slane %v494_v45, 7  ;;  %v556_v58 = vrot.slane %v495_v46, 7  ;;  %v572_v59 = vrot.slane %v494_v45, 1 }
 0x1d0   :  { %v1278_v51 = vunpack.i.h.bf16 %v1276_v47  ;;  %v1277_v52 = vunpack.i.l.bf16 %v1276_v47  ;;  %v573_v62 = vrot.slane %v495_v46, 1 }
 0x1d1   :  { %1211 = vmatprep.mubr.msk.bf16.mxu0 %vm630_vm3, %v595_v50  ;;  %v562_v10 = vsel %vm559_vm2, %v555_v56, %v556_v58 }
 0x1d2   :  { %v496_v60 = vsel %vm493_vm1, %v491_v54, %v1277_v52  ;;  %v497_v61 = vsel %vm493_vm1, %v492_v55, %v1278_v51  ;;  %v579_v15 = vsel %vm576_vm5, %v572_v59, %v573_v62 }
 0x1d3   :  { %v557_v63 = vrot.slane %v496_v60, 7  ;;  %v558_v0 = vrot.slane %v497_v61, 7  ;;  %v574_v1 = vrot.slane %v496_v60, 1  ;;  %v596_v2 = vpack.c.bf16 %v497_v61, %v496_v60 }
 0x1d4   :  { %v575_v22 = vrot.slane %v497_v61, 1 }
 0x1d5   :  { %v560_v7 = vsel %vm559_vm2, %v557_v63, %v558_v0  ;;  %v561_v8 = vsel %vm559_vm2, %v556_v58, %v557_v63  ;;  %1212 = vmatmul.mubr.msk.bf16.vlgmr.msra.gmra.mxu0 %vm630_vm3, %v596_v2  ;;  %v563_v11 = vsel %vm559_vm2, %v558_v0, %v555_v56  ;;  %v578_v12 = vsel %vm576_vm5, %v573_v62, %v574_v1 }
 0x1d6   :  { %v566_v9 = vsel %vm1588_vm4, %v561_v8, 0.0  ;;  %1228 = vmatpush3.bf16.msra.mxu0 %v1568_v18  ;;  %v564_v14 = vsel %vm1599_vm6, %v563_v11, 0.0  ;;  %v582_v16 = vsel %vm1603_vm7, %v578_v12, 0.0  ;;  %v1290_v18 = vld [vmem:[%s1678_s6 + $0x40] sm:$0xff]   ;;  %v580_v23 = vsel %vm576_vm5, %v575_v22, %v572_v59 }
 0x1d7   :  { %v586_v13 = vpack.c.bf16 %v560_v7, %v566_v9  ;;  %1229 = vmatprep.subr.bf16.mxu0 %v1288_v3  ;;  %v585_v17 = vpack.c.bf16 %v562_v10, %v564_v14  ;;  %v765_v19 = vpack.c.bf16 %v582_v16, %v579_v15  ;;  %v577_v24 = vsel %vm576_vm5, %v574_v1, %v575_v22  ;;  %v1057_v15 = vld [vmem:[%s1681_s9] ss:$0 sm:$0xff] }
 0x1d8   :  { %v584_v25 = vsel %vm571_vm8, %v580_v23, 0.0 }
 0x1d9   :  { %1223 = vmatprep.mubr.msk.bf16.mxu1 %vm630_vm3, %v585_v17  ;;  %1235 = vmatprep.mubr.msk.bf16.mxu0 %vm630_vm3, %v765_v19  ;;  %v766_v26 = vpack.c.bf16 %v584_v25, %v577_v24 }
 0x1da   :  { %1230 = vmatpush3.bf16.msra.mxu0 %v1288_v3  ;;  %1224 = vmatmul.mubr.msk.bf16.vlgmr.msra.gmra.mxu1 %vm630_vm3, %v586_v13 }
 0x1db   :  { %1231 = vmatprep.subr.bf16.mxu0 %v1289_v20  ;;  %1240 = vmatpush3.bf16.msra.mxu1 %v1291_v28 }
 0x1dc   :  { %1241 = vmatprep.subr.bf16.mxu1 %v1318_v39  ;;  %1247 = vmatprep.mubr.msk.bf16.mxu1 %vm1321_vm9, %v1318_v39 }
 0x1de   :  { %1232 = vmatpush3.bf16.msra.mxu0 %v1289_v20 }
 0x1df   :  { %1233 = vmatprep.subr.bf16.mxu0 %v1290_v18  ;;  %1242 = vmatpush3.bf16.msra.mxu1 %v1292_v29 }
 0x1e0   :  { %1243 = vmatprep.subr.bf16.mxu1 %v1318_v39 }
 0x1e2   :  { %1234 = vmatpush3.bf16.msra.mxu0 %v1290_v18 }
 0x1e3   :  { %1244 = vmatpush3.bf16.msra.mxu1 %v1293_v27 }
 0x1e4   :  { %1245 = vmatprep.subr.bf16.mxu1 %v1318_v39 }
 0x1e5   :  { %1236 = vmatmul.mubr.msk.bf16.vlgmr.msra.gmra.mxu0 %vm630_vm3, %v766_v26 }
 0x1e7   :  { %1246 = vmatpush3.bf16.msra.mxu1 %v1294_v30 }
 0x295   :  { %v1213_v31 = vpop.f32.mrf.mxu0 }
 0x297   :  { %v671_v32 = vpop.f32.mrf.mxu0 }
 0x299   :  { %v1214_v34 = vpop.f32.mrf.mxu0 }
 0x29a   :  { %v1225_v33 = vpop.f32.mrf.mxu1 }
 0x29b   :  { %v674_v37 = vpop.f32.mrf.mxu0  ;;  %v759_v40 = vadd.f32 %v1225_v33, %v1213_v31 }
 0x29c   :  { %v750_v36 = vpop.f32.mrf.mxu1 }
 0x29d   :  { %v751_v42 = vadd.f32 %v750_v36, %v671_v32 }
 0x29e   :  { %v1226_v38 = vpop.f32.mrf.mxu1 }
 0x29f   :  { %v762_v46 = vadd.f32 %v1226_v38, %v1214_v34 }
 0x2a0   :  { %v753_v43 = vpop.f32.mrf.mxu1 }
 0x2a1   :  { %v754_v48 = vadd.f32 %v753_v43, %v674_v37 }
 0x2a5   :  { %v1237_v41 = vpop.f32.mrf.mxu0 }
 0x2a6   :  { %v857_v35 = vadd.f32 %v1237_v41, %v759_v40 }
 0x2a7   :  { %v840_v45 = vpop.f32.mrf.mxu0 }
 0x2a8   :  { %v855_v39 = vadd.f32 %v840_v45, %v751_v42  ;;  %v868_v49 = vadd.f32 %v1056_v44, %v857_v35 }
 0x2a9   :  { %v1238_v47 = vpop.f32.mrf.mxu0 }
 0x2aa   :  { %v858_v50 = vadd.f32 %v1238_v47, %v762_v46  ;;  %v866_v52 = vadd.f32 %v1056_v44, %v855_v39  ;;  %v879_v55 = vsel %vm630_vm3, %v868_v49, -inf }
 0x2ab   :  { %v843_v51 = vpop.f32.mrf.mxu0 }
 0x2ac   :  { %v869_v53 = vadd.f32 %v1056_v44, %v858_v50  ;;  %v856_v54 = vadd.f32 %v843_v51, %v754_v48  ;;  %v870_v59 = vsel %vm630_vm3, %v866_v52, -inf }
 0x2ae   :  { %v880_v56 = vsel %vm630_vm3, %v869_v53, -inf  ;;  %v867_v57 = vadd.f32 %v1056_v44, %v856_v54 }
 0x2af   :  { %v881_v58 = vmax.f32 %v879_v55, %v880_v56 }
 0x2b0   :  { %v871_v60 = vsel %vm630_vm3, %v867_v57, -inf }
 0x2b1   :  { %v882_v61 = vrot.slane %v881_v58, 4  ;;  %v872_v62 = vmax.f32 %v870_v59, %v871_v60 }
 0x2b3   :  { %v883_v63 = vmax.f32 %v881_v58, %v882_v61  ;;  %v873_v0 = vrot.slane %v872_v62, 4 }
 0x2b5   :  { %v884_v1 = vrot.slane %v883_v63, 2  ;;  %v874_v2 = vmax.f32 %v872_v62, %v873_v0 }
 0x2b7   :  { %v885_v3 = vmax.f32 %v883_v63, %v884_v1  ;;  %v875_v4 = vrot.slane %v874_v2, 2 }
 0x2b9   :  { %v886_v5 = vrot.slane %v885_v3, 1  ;;  %v876_v6 = vmax.f32 %v874_v2, %v875_v4 }
 0x2bb   :  { %v887_v7 = vmax.f32 %v885_v3, %v886_v5  ;;  %v877_v8 = vrot.slane %v876_v6, 1 }
 0x2bd   :  { %v878_v9 = vmax.f32 %v876_v6, %v877_v8  ;;  %v889_v10 = vmax.f32 %v887_v7, 0.0 }
 0x2bf   :  { %v888_v11 = vmax.f32 %v878_v9, 0.0 }
 0x2c1   :  { %v893_v12 = vsel %vm892_vm10, %v889_v10, %v888_v11 }
 0x2c2   :  { %v896_v13 = vsel %vm895_vm11, %v893_v12, 0.0 }
 0x2c3   :  { %v897_v14 = vpack.c.bf16 %v896_v13, %v896_v13 }
 0x2c5   :  { %1248 = vmatmul.mubr.msk.bf16.vlgmr.msra.gmra.mxu1 %vm630_vm3, %v897_v14 }
 0x385   :  { %v974_v16 = vpop.f32.mrf.mxu1 }
 0x386   :  { %v975_v17 = vadd.f32 %v1057_v15, %v974_v16 }
 0x387   :  { %v1249_v19 = vpop.f32.mrf.mxu1 }
 0x388   :  { %980 = vst [vmem:[#allocation2] sm:$0xff] %v975_v17 }
 0x389   :  { %v977_v20 = vpop.f32.mrf.mxu1 }
 0x38a   :  { %1306 = shalt.err (!%p1303_p4)
}
 0x38b   :  { %990 = dma.vmem_to_hbm [thread:$0]  %s988_s12, 128, %s1682_s10, [#allocation3]   ;;  %v1250_v21 = vpop.f32.mrf.mxu1 }
 0x38c   :  { %1315 = dma.done.wait [#allocation3], 128  }
 0x38d   :  { %1316 = vsyncadd [#allocation3], 4294967168 }
 0x38e   :  { %994 = vsyncpa [#allocation3], 1 }

</bundles_post_ra>
